<compile_context>
chip_gen: v5e
topology: v5e:2x2
jax: 0.10.0
libtpu: 0.0.40
codegen_flags: <defaults>
</compile_context>

<pallas_src>
import jax
import jax.numpy as jnp
from jax.experimental import pallas as pl
from jax.experimental.pallas import tpu as pltpu


def policy_kernel(x_ref, p1_ref, p2_ref, o_ref):
    # x_ref:  (Bt, 4)      block of states
    # p1_ref: (5, H)       rows 0..3 = fc1 weight (transposed), row 4 = fc1 bias
    # p2_ref: (H+1, 2)     rows 0..H-1 = fc2 weight (transposed), row H = fc2 bias
    # o_ref:  (Bt, 2)      per-state action probabilities
    x = x_ref[...]
    p1 = p1_ref[...]
    p2 = p2_ref[...]

    w1t = p1[:4, :]          # (4, H)
    b1 = p1[4:5, :]          # (1, H)
    kh = p2.shape[0] - 1
    w2t = p2[:kh, :]         # (H, 2)
    b2 = p2[kh:, :]          # (1, 2)

    # fc1 + ReLU
    h = jnp.dot(x, w1t, preferred_element_type=jnp.float32) + b1
    h = jnp.maximum(h, 0.0)

    # fc2
    logits = jnp.dot(h, w2t, preferred_element_type=jnp.float32) + b2

    # softmax over the 2 action logits (== torch softmax(dim=0) on each (2,) output)
    m = jnp.max(logits, axis=-1, keepdims=True)
    e = jnp.exp(logits - m)
    o_ref[...] = e / jnp.sum(e, axis=-1, keepdims=True)


def preprocess_params(w1, b1, w2, b2):
    """One-time parameter packing (hoisted out of the per-step forward).

    w1: (H, 4), b1: (H,), w2: (2, H), b2: (2,)  ->  p1: (5, H), p2: (H+1, 2)
    """
    p1 = jnp.concatenate([w1.T, b1[None, :]], axis=0).astype(jnp.float32)   # (5, H)
    p2 = jnp.concatenate([w2.T, b2[None, :]], axis=0).astype(jnp.float32)   # (H+1, 2)
    return p1, p2


def policy_forward_batched(xb, p1, p2, *, block_b=128):
    """xb: (B, 4) float32 states. Returns (B, 2) action probabilities."""
    B = xb.shape[0]
    H = p1.shape[1]
    if B < block_b or B % block_b != 0:
        block_b = B                      # small / ragged batch: one block covers it
    grid = (B // block_b,)

    return pl.pallas_call(
        policy_kernel,
        out_shape=jax.ShapeDtypeStruct((B, 2), jnp.float32),
        grid_spec=pltpu.PrefetchScalarGridSpec(
            num_scalar_prefetch=0,
            grid=grid,
            in_specs=[
                pl.BlockSpec((block_b, 4), lambda i: (i, 0)),   # per-step row block
                pl.BlockSpec((5, H), lambda i: (0, 0)),         # resident across grid
                pl.BlockSpec((H + 1, 2), lambda i: (0, 0)),     # resident across grid
            ],
            out_specs=pl.BlockSpec((block_b, 2), lambda i: (i, 0)),
        ),
        compiler_params=pltpu.CompilerParams(
            dimension_semantics=("parallel",),   # lets v7x split the batch over 2 TCs
        ),
    )(xb, p1, p2)


def policy_forward(x, p1, p2):
    """Single-state path matching the torch module: x (4,) -> probs (2,)."""
    return policy_forward_batched(x.reshape(1, 4), p1, p2)[0]


def init_policy_params(key, dim_hidden):
    """Deterministic init mirroring nn.Linear default (uniform +/- 1/sqrt(fan_in))."""
    k1, k2, k3, k4 = jax.random.split(key, 4)
    bound1 = 1.0 / jnp.sqrt(4.0)
    bound2 = 1.0 / jnp.sqrt(float(dim_hidden))
    w1 = jax.random.uniform(k1, (dim_hidden, 4), jnp.float32, -bound1, bound1)
    b1 = jax.random.uniform(k2, (dim_hidden,), jnp.float32, -bound1, bound1)
    w2 = jax.random.uniform(k3, (2, dim_hidden), jnp.float32, -bound2, bound2)
    b2 = jax.random.uniform(k4, (2,), jnp.float32, -bound2, bound2)
    return w1, b1, w2, b2


def policy_forward_ref(xb, w1, b1, w2, b2):
    h = jnp.maximum(jnp.dot(xb, w1.T, precision="highest") + b1, 0.0)
    logits = jnp.dot(h, w2.T, precision="highest") + b2
    return jax.nn.softmax(logits, axis=-1)


if __name__ == "__main__":
    key = jax.random.PRNGKey(0)
    kx, kp = jax.random.split(key)

    dim_hidden = 32
    batch = 256                                         # multiple of the 128-row block
    w1, b1, w2, b2 = init_policy_params(kp, dim_hidden)
    p1, p2 = preprocess_params(w1, b1, w2, b2)          # one-time packing

    xb = jax.random.normal(kx, (batch, 4), jnp.float32)  # batch of CartPole-like states

    # Batched forward (grid over the batch, weights resident in VMEM).
    out_b = jax.block_until_ready(policy_forward_batched(xb, p1, p2))
    ref_b = policy_forward_ref(xb, w1, b1, w2, b2)
    assert out_b.shape == (batch, 2)
    assert jnp.allclose(out_b, ref_b, atol=1e-5, rtol=1e-5)
    assert jnp.allclose(jnp.sum(out_b, axis=-1), 1.0, atol=1e-5)

    # Single-state path (exactly the torch module's forward on a (4,) state).
    x1 = xb[0]
    out1 = jax.block_until_ready(policy_forward(x1, p1, p2))
    ref1 = policy_forward_ref(x1[None, :], w1, b1, w2, b2)[0]
    assert out1.shape == (2,)
    assert jnp.allclose(out1, ref1, atol=1e-5, rtol=1e-5)

    print("KERNEL_OK")
</pallas_src>

<mosaic_0001>
module attributes {stable_mosaic.version = 11 : i64} {
  func.func @policy_kernel(%arg0: i32, %arg1: memref<128x4xf32, #tpu.memory_space<vmem>>, %arg2: memref<5x32xf32, #tpu.memory_space<vmem>>, %arg3: memref<33x2xf32, #tpu.memory_space<vmem>>, %arg4: memref<128x2xf32, #tpu.memory_space<vmem>>) attributes {dimension_semantics = [#tpu.dimension_semantics<parallel>], iteration_bounds = array<i64: 2>, scalar_prefetch = 0 : i64, scratch_operands = 0 : i64, tpu.core_type = #tpu.core_type<tc>, window_params = [{transform_indices = @transform_0, window_bounds = array<i64: 128, 4>}, {pipeline_mode = #tpu.pipeline_mode<synchronous>, transform_indices = @transform_1, window_bounds = array<i64: 5, 32>}, {pipeline_mode = #tpu.pipeline_mode<synchronous>, transform_indices = @transform_2, window_bounds = array<i64: 33, 2>}, {transform_indices = @transform_3, window_bounds = array<i64: 128, 2>}]} {
    %c0 = arith.constant 0 : index
    %c0_0 = arith.constant 0 : index
    %0 = vector.load %arg1[%c0, %c0_0] : memref<128x4xf32, #tpu.memory_space<vmem>>, vector<128x4xf32>
    %c0_1 = arith.constant 0 : index
    %c0_2 = arith.constant 0 : index
    %1 = vector.load %arg2[%c0_1, %c0_2] : memref<5x32xf32, #tpu.memory_space<vmem>>, vector<5x32xf32>
    %c0_3 = arith.constant 0 : index
    %c0_4 = arith.constant 0 : index
    %2 = vector.load %arg3[%c0_3, %c0_4] : memref<33x2xf32, #tpu.memory_space<vmem>>, vector<33x2xf32>
    %3 = vector.extract_strided_slice %1 {offsets = [0, 0], sizes = [4, 32], strides = [1, 1]} : vector<5x32xf32> to vector<4x32xf32>
    %4 = vector.extract_strided_slice %1 {offsets = [4, 0], sizes = [1, 32], strides = [1, 1]} : vector<5x32xf32> to vector<1x32xf32>
    %5 = vector.extract_strided_slice %2 {offsets = [0, 0], sizes = [32, 2], strides = [1, 1]} : vector<33x2xf32> to vector<32x2xf32>
    %6 = vector.extract_strided_slice %2 {offsets = [32, 0], sizes = [1, 2], strides = [1, 1]} : vector<33x2xf32> to vector<1x2xf32>
    %cst = arith.constant dense<0.000000e+00> : vector<128x32xf32>
    %7 = tpu.matmul %0, %3, %cst {dimension_numbers = #tpu.dot_dimension_numbers<[1], [0], [0], [1], [0, 0, 1, 1], [], []>} : vector<128x4xf32>, vector<4x32xf32>, vector<128x32xf32> -> vector<128x32xf32>
    %8 = vector.broadcast %4 : vector<1x32xf32> to vector<128x32xf32>
    %9 = arith.addf %7, %8 : vector<128x32xf32>
    %cst_5 = arith.constant 0.000000e+00 : f32
    %10 = vector.broadcast %cst_5 : f32 to vector<128x32xf32>
    %11 = arith.maximumf %9, %10 : vector<128x32xf32>
    %cst_6 = arith.constant dense<0.000000e+00> : vector<128x2xf32>
    %12 = tpu.matmul %11, %5, %cst_6 {dimension_numbers = #tpu.dot_dimension_numbers<[1], [0], [0], [1], [0, 0, 1, 1], [], []>} : vector<128x32xf32>, vector<32x2xf32>, vector<128x2xf32> -> vector<128x2xf32>
    %13 = vector.broadcast %6 : vector<1x2xf32> to vector<128x2xf32>
    %14 = arith.addf %12, %13 : vector<128x2xf32>
    %cst_7 = arith.constant dense<0xFF800000> : vector<128xf32>
    %15 = vector.multi_reduction <maximumf>, %14, %cst_7 [1] : vector<128x2xf32> to vector<128xf32>
    %16 = vector.shape_cast %15 : vector<128xf32> to vector<128x1xf32>
    %17 = vector.broadcast %16 : vector<128x1xf32> to vector<128x2xf32>
    %18 = arith.subf %14, %17 : vector<128x2xf32>
    %19 = math.exp %18 : vector<128x2xf32>
    %cst_8 = arith.constant dense<0.000000e+00> : vector<128xf32>
    %20 = vector.multi_reduction <add>, %19, %cst_8 [1] : vector<128x2xf32> to vector<128xf32>
    %21 = vector.shape_cast %20 : vector<128xf32> to vector<128x1xf32>
    %22 = vector.broadcast %21 : vector<128x1xf32> to vector<128x2xf32>
    %23 = arith.divf %19, %22 : vector<128x2xf32>
    %c0_9 = arith.constant 0 : index
    %c0_10 = arith.constant 0 : index
    %24 = vector.load %arg4[%c0_9, %c0_10] : memref<128x2xf32, #tpu.memory_space<vmem>>, vector<128x2xf32>
    tpu.vector_store %arg4[%c0_9, %c0_10], %23 {strides = array<i32>} : memref<128x2xf32, #tpu.memory_space<vmem>>, vector<128x2xf32>,
    return
  }
  func.func @transform_0(%arg0: i32) -> (i32, i32) {
    %c0_i32 = arith.constant 0 : i32
    %c0_i32_0 = arith.constant 0 : i32
    return %arg0, %c0_i32 : i32, i32
  }
  func.func @transform_1(%arg0: i32) -> (i32, i32) {
    %c0_i32 = arith.constant 0 : i32
    %c0_i32_0 = arith.constant 0 : i32
    %c0_i32_1 = arith.constant 0 : i32
    return %c0_i32, %c0_i32_0 : i32, i32
  }
  func.func @transform_2(%arg0: i32) -> (i32, i32) {
    %c0_i32 = arith.constant 0 : i32
    %c0_i32_0 = arith.constant 0 : i32
    %c0_i32_1 = arith.constant 0 : i32
    return %c0_i32, %c0_i32_0 : i32, i32
  }
  func.func @transform_3(%arg0: i32) -> (i32, i32) {
    %c0_i32 = arith.constant 0 : i32
    %c0_i32_0 = arith.constant 0 : i32
    return %arg0, %c0_i32 : i32, i32
  }
}

</mosaic_0001>

<bundles_post_ra>
// kernel: tpu_custom_call.1
= control target key start
LH: loop header
LB: loop body
LE: loop exit
PB: predicated region body
PF: predicated region fallthrough
CT: control target
= control target key end

     0   :  { %s1053_s12 = smov 0   ;;  %s1371_s0 = inlined_call_operand.vmem [shape: f32[256,4], index: 0, kind: input, shape index: {}]   ;;  %s1372_s1 = inlined_call_operand.vmem [shape: f32[5,32], index: 1, kind: input, shape index: {}]   ;;  %s1373_s2 = inlined_call_operand.vmem [shape: f32[33,2], index: 2, kind: input, shape index: {}]   ;;  %s1374_s3 = inlined_call_operand.vmem [shape: f32[256,2], index: 3, kind: output, shape index: {}]  }
   0x1 LB: > { %s903_s13 = sadd.s32 4294967295, %s1031_s12   ;;  %p907_p0 = scmp.ge.s32.totalorder %s1031_s12, 1  ;;  %s1031_s12 = sphi %s1053_s12, %s13_s12  }
   0x2   : > { %p138_p1 = scmp.lt.s32.totalorder %s1031_s12, 3 }
   0x4   : > { %p139_p2 = pnand %p907_p0, %p138_p1 }
   0x5   : > { %s908_s16 = sshll.u32 (!%p139_p2), %s903_s13, 4 }
   0x6   : > { %142 = sbr.rel (%p139_p2) target bundleno = 664 (0x298), region = 32  ;;  %p163_p3 = scmp.lt.s32.totalorder (!%p139_p2), %s908_s16, 31 }
   0xb   : > { %v190_v0 = vld [vmem:[%s1372_s1] sm:$0x1f]  ;;  %vm246_vm0 = vcmask 1043456   ;;  %s1376_s16 = smov (!%p163_p3, %s908_s16), 31  ;;  %vm197_vm1 = vcmask 31744   ;;  %v194_v11 = vld [vmem:[%s1373_s2 + $0x18] sm:$0xff] }
   0xc   : > { %912 = vmatpush.msk.msra.mxu0 %vm246_vm0, %v190_v0  ;;  %947 = vmatpush.msk.msra.mxu3 %vm246_vm0, %v190_v0  ;;  %s909_s17 = sshll.u32 %s1376_s16, 3  ;;  %v193_v18 = vld [vmem:[%s1373_s2 + $0x10] sm:$0xff]  ;;  %v192_v19 = vld [vmem:[%s1373_s2 + $0x8] sm:$0xff]  ;;  %v191_v20 = vld [vmem:[%s1373_s2] sm:$0xff]  ;;  %v1118_v21 = vperm.slane %v190_v0, 4  ;;  %vm332_vm2 = vcmask 261120  }
   0xd   : > { %s1072_s20 = scalar_lea.vmem %s1371_s0, %s909_s17  ;;  %393 = vmatpush.msra.mxu1 %v194_v11  ;;  %948 = vmatpush.msra.mxu2 %v194_v11  ;;  %vm446_vm3 = vcmask 15360   ;;  %s1318_s6 = scalar_lea.vmem %s1374_s3, %s909_s17 }
   0xe   : > { %v174_v1 = vld [vmem:[%s1072_s20] sm:$0xff]  ;;  %v175_v2 = vld [vmem:[%s1072_s20 + $0x8] sm:$0xff]  ;;  %v176_v3 = vld [vmem:[%s1072_s20 + $0x10] sm:$0xff] }
   0xf   : > { %913 = vmatmul.msk.f32.vlgmr.msra.gmra.mxu0 %vm197_vm1, %v174_v1  ;;  %v177_v4 = vld [vmem:[%s1072_s20 + $0x18] sm:$0xff]  ;;  %v178_v5 = vld [vmem:[%s1072_s20 + $0x20] sm:$0xff]  ;;  %v183_v6 = vld [vmem:[%s1072_s20 + $0x48] sm:$0xff]  ;;  %394 = vmatpush.msra.mxu1 %v193_v18 }
  0x10   : > { %922 = vmatmul.msk.f32.vlgmr.msra.gmra.mxu3 %vm197_vm1, %v183_v6  ;;  %v179_v7 = vld [vmem:[%s1072_s20 + $0x28] sm:$0xff]  ;;  %v184_v8 = vld [vmem:[%s1072_s20 + $0x50] sm:$0xff]  ;;  %v185_v10 = vld [vmem:[%s1072_s20 + $0x58] sm:$0xff]  ;;  %949 = vmatpush.msra.mxu2 %v193_v18 }
  0x11   : > { %v180_v9 = vld [vmem:[%s1072_s20 + $0x30] sm:$0xff]  ;;  %v181_v12 = vld [vmem:[%s1072_s20 + $0x38] sm:$0xff]  ;;  %v186_v13 = vld [vmem:[%s1072_s20 + $0x60] sm:$0xff]  ;;  %395 = vmatpush.msra.mxu1 %v192_v19 }
  0x12   : > { %v182_v14 = vld [vmem:[%s1072_s20 + $0x40] sm:$0xff]  ;;  %v187_v15 = vld [vmem:[%s1072_s20 + $0x68] sm:$0xff]  ;;  %v188_v16 = vld [vmem:[%s1072_s20 + $0x70] sm:$0xff]  ;;  %950 = vmatpush.msra.mxu2 %v192_v19 }
  0x13   : > { %v189_v17 = vld [vmem:[%s1072_s20 + $0x78] sm:$0xff]  ;;  %396 = vmatpush.msra.mxu1 %v191_v20  ;;  %v1155_v6 = vld [vmem:[%s1373_s2 + $0x20] ss:$0 sm:$0xff] }
  0x14   : > { %951 = vmatpush.msra.mxu2 %v191_v20 }
  0x17   : > { %914 = vmatmul.msk.f32.gmra.mxu0 %vm197_vm1, %v175_v2 }
  0x18   : > { %923 = vmatmul.msk.f32.gmra.mxu3 %vm197_vm1, %v184_v8 }
  0x1f   : > { %915 = vmatmul.msk.f32.gmra.mxu0 %vm197_vm1, %v176_v3 }
  0x20   : > { %924 = vmatmul.msk.f32.gmra.mxu3 %vm197_vm1, %v185_v10 }
  0x27   : > { %916 = vmatmul.msk.f32.gmra.mxu0 %vm197_vm1, %v177_v4 }
  0x28   : > { %925 = vmatmul.msk.f32.gmra.mxu3 %vm197_vm1, %v186_v13 }
  0x2f   : > { %917 = vmatmul.msk.f32.gmra.mxu0 %vm197_vm1, %v178_v5 }
  0x30   : > { %926 = vmatmul.msk.f32.gmra.mxu3 %vm197_vm1, %v187_v15 }
  0x37   : > { %918 = vmatmul.msk.f32.gmra.mxu0 %vm197_vm1, %v179_v7 }
  0x38   : > { %927 = vmatmul.msk.f32.gmra.mxu3 %vm197_vm1, %v188_v16 }
  0x3f   : > { %919 = vmatmul.msk.f32.gmra.mxu0 %vm197_vm1, %v180_v9 }
  0x40   : > { %928 = vmatmul.msk.f32.gmra.mxu3 %vm197_vm1, %v189_v17 }
  0x47   : > { %920 = vmatmul.msk.f32.gmra.mxu0 %vm197_vm1, %v181_v12 }
  0x4f   : > { %921 = vmatmul.msk.f32.gmra.mxu0 %vm197_vm1, %v182_v14 }
  0x8c   : > { %v267_v22 = vpop.f32.mrf.mxu0 }
  0x8d   : > { %v268_v23 = vadd.f32 %v267_v22, %v1118_v21 }
  0x8f   : > { %v315_v24 = vmax.f32 %v268_v23, 0.0 }
  0x91   : > { %929 = vmatmul.msk.f32.vlgmr.msra.gmra.mxu1 %vm332_vm2, %v315_v24 }
  0x93   : > { %v294_v43 = vpop.f32.mrf.mxu3 }
  0x94   : > { %v270_v25 = vpop.f32.mrf.mxu0  ;;  %v295_v51 = vadd.f32 %v294_v43, %v1118_v21 }
  0x95   : > { %v271_v26 = vadd.f32 %v270_v25, %v1118_v21 }
  0x96   : > { %v324_v52 = vmax.f32 %v295_v51, 0.0 }
  0x97   : > { %v316_v27 = vmax.f32 %v271_v26, 0.0 }
  0x99   : > { %930 = vmatmul.msk.f32.gmra.mxu1 %vm332_vm2, %v316_v27 }
  0x9b   : > { %v297_v48 = vpop.f32.mrf.mxu3 }
  0x9c   : > { %v273_v28 = vpop.f32.mrf.mxu0  ;;  %v298_v54 = vadd.f32 %v297_v48, %v1118_v21 }
  0x9d   : > { %v274_v29 = vadd.f32 %v273_v28, %v1118_v21 }
  0x9e   : > { %v325_v55 = vmax.f32 %v298_v54, 0.0 }
  0x9f   : > { %v317_v30 = vmax.f32 %v274_v29, 0.0 }
  0xa1   : > { %931 = vmatmul.msk.f32.gmra.mxu1 %vm332_vm2, %v317_v30 }
  0xa3   : > { %v300_v53 = vpop.f32.mrf.mxu3 }
  0xa4   : > { %v276_v31 = vpop.f32.mrf.mxu0  ;;  %v301_v57 = vadd.f32 %v300_v53, %v1118_v21 }
  0xa5   : > { %v277_v32 = vadd.f32 %v276_v31, %v1118_v21 }
  0xa6   : > { %v326_v58 = vmax.f32 %v301_v57, 0.0 }
  0xa7   : > { %v318_v33 = vmax.f32 %v277_v32, 0.0 }
  0xa9   : > { %932 = vmatmul.msk.f32.gmra.mxu1 %vm332_vm2, %v318_v33 }
  0xab   : > { %v303_v56 = vpop.f32.mrf.mxu3 }
  0xac   : > { %v279_v34 = vpop.f32.mrf.mxu0  ;;  %v304_v59 = vadd.f32 %v303_v56, %v1118_v21 }
  0xad   : > { %v280_v35 = vadd.f32 %v279_v34, %v1118_v21 }
  0xae   : > { %v327_v61 = vmax.f32 %v304_v59, 0.0 }
  0xaf   : > { %v319_v36 = vmax.f32 %v280_v35, 0.0 }
  0xb1   : > { %933 = vmatmul.msk.f32.gmra.mxu1 %vm332_vm2, %v319_v36 }
  0xb3   : > { %v306_v60 = vpop.f32.mrf.mxu3 }
  0xb4   : > { %v282_v37 = vpop.f32.mrf.mxu0  ;;  %v307_v62 = vadd.f32 %v306_v60, %v1118_v21 }
  0xb5   : > { %v283_v38 = vadd.f32 %v282_v37, %v1118_v21 }
  0xb6   : > { %v328_v0 = vmax.f32 %v307_v62, 0.0 }
  0xb7   : > { %v320_v39 = vmax.f32 %v283_v38, 0.0 }
  0xb9   : > { %934 = vmatmul.msk.f32.gmra.mxu1 %vm332_vm2, %v320_v39 }
  0xbb   : > { %v309_v63 = vpop.f32.mrf.mxu3 }
  0xbc   : > { %v285_v40 = vpop.f32.mrf.mxu0  ;;  %v310_v1 = vadd.f32 %v309_v63, %v1118_v21 }
  0xbd   : > { %v286_v41 = vadd.f32 %v285_v40, %v1118_v21 }
  0xbe   : > { %v329_v2 = vmax.f32 %v310_v1, 0.0 }
  0xbf   : > { %v321_v42 = vmax.f32 %v286_v41, 0.0 }
  0xc1   : > { %935 = vmatmul.msk.f32.gmra.mxu1 %vm332_vm2, %v321_v42 }
  0xc3   : > { %v312_v3 = vpop.f32.mrf.mxu3 }
  0xc4   : > { %v288_v44 = vpop.f32.mrf.mxu0  ;;  %v313_v4 = vadd.f32 %v312_v3, %v1118_v21 }
  0xc5   : > { %v289_v45 = vadd.f32 %v288_v44, %v1118_v21 }
  0xc6   : > { %v330_v5 = vmax.f32 %v313_v4, 0.0 }
  0xc7   : > { %v322_v46 = vmax.f32 %v289_v45, 0.0 }
  0xc9   : > { %936 = vmatmul.msk.f32.gmra.mxu1 %vm332_vm2, %v322_v46 }
  0xcc   : > { %v291_v47 = vpop.f32.mrf.mxu0 }
  0xcd   : > { %v292_v49 = vadd.f32 %v291_v47, %v1118_v21 }
  0xcf   : > { %v323_v50 = vmax.f32 %v292_v49, 0.0 }
  0xd1   : > { %937 = vmatmul.msk.f32.vlgmr.msra.gmra.mxu2 %vm332_vm2, %v323_v50 }
  0xd9   : > { %938 = vmatmul.msk.f32.gmra.mxu2 %vm332_vm2, %v324_v52 }
  0xe1   : > { %939 = vmatmul.msk.f32.gmra.mxu2 %vm332_vm2, %v325_v55 }
  0xe9   : > { %940 = vmatmul.msk.f32.gmra.mxu2 %vm332_vm2, %v326_v58 }
  0xf1   : > { %941 = vmatmul.msk.f32.gmra.mxu2 %vm332_vm2, %v327_v61 }
  0xf9   : > { %942 = vmatmul.msk.f32.gmra.mxu2 %vm332_vm2, %v328_v0 }
 0x101   : > { %943 = vmatmul.msk.f32.gmra.mxu2 %vm332_vm2, %v329_v2 }
 0x109   : > { %944 = vmatmul.msk.f32.gmra.mxu2 %vm332_vm2, %v330_v5 }
 0x10e   : > { %v398_v7 = vpop.f32.mrf.mxu1 }
 0x10f   : > { %v399_v8 = vadd.f32 %v1155_v6, %v398_v7 }
 0x111   : > { %v447_v9 = vsel %vm446_vm3, %v399_v8, -inf }
 0x112   : > { %448 = vmax.xlane.f32.xlu0 %v447_v9 }
 0x116   : > { %v401_v10 = vpop.f32.mrf.mxu1 }
 0x117   : > { %v1160_v11 = vadd.f32 %v1155_v6, %v401_v10 }
 0x119   : > { %v450_v12 = vsel %vm446_vm3, %v1160_v11, -inf }
 0x11a   : > { %451 = vmax.xlane.f32.xlu0 %v450_v12 }
 0x11e   : > { %v404_v13 = vpop.f32.mrf.mxu1 }
 0x11f   : > { %v1165_v14 = vadd.f32 %v1155_v6, %v404_v13 }
 0x121   : > { %v453_v15 = vsel %vm446_vm3, %v1165_v14, -inf }
 0x122   : > { %454 = vmax.xlane.f32.xlu1 %v453_v15 }
 0x126   : > { %v407_v16 = vpop.f32.mrf.mxu1 }
 0x127   : > { %v1170_v17 = vadd.f32 %v1155_v6, %v407_v16 }
 0x129   : > { %v456_v18 = vsel %vm446_vm3, %v1170_v17, -inf }
 0x12a   : > { %457 = vmax.xlane.f32.xlu1 %v456_v18 }
 0x12e   : > { %v410_v19 = vpop.f32.mrf.mxu1 }
 0x12f   : > { %v1175_v20 = vadd.f32 %v1155_v6, %v410_v19 }
 0x131   : > { %v459_v21 = vsel %vm446_vm3, %v1175_v20, -inf }
 0x132   : > { %460 = vmax.xlane.f32.xlu2 %v459_v21 }
 0x136   : > { %v413_v22 = vpop.f32.mrf.mxu1 }
 0x137   : > { %v1180_v23 = vadd.f32 %v1155_v6, %v413_v22 }
 0x139   : > { %v462_v24 = vsel %vm446_vm3, %v1180_v23, -inf }
 0x13a   : > { %463 = vmax.xlane.f32.xlu2 %v462_v24 }
 0x13e   : > { %v416_v25 = vpop.f32.mrf.mxu1 }
 0x13f   : > { %v1185_v26 = vadd.f32 %v1155_v6, %v416_v25 }
 0x141   : > { %v465_v27 = vsel %vm446_vm3, %v1185_v26, -inf }
 0x142   : > { %466 = vmax.xlane.f32.xlu0 %v465_v27 }
 0x146   : > { %v419_v28 = vpop.f32.mrf.mxu1 }
 0x147   : > { %v1190_v29 = vadd.f32 %v1155_v6, %v419_v28 }
 0x149   : > { %v468_v30 = vsel %vm446_vm3, %v1190_v29, -inf }
 0x14a   : > { %469 = vmax.xlane.f32.xlu1 %v468_v30 }
 0x154   : > { %v422_v31 = vpop.f32.mrf.mxu2 }
 0x155   : > { %v1195_v32 = vadd.f32 %v1155_v6, %v422_v31 }
 0x157   : > { %v471_v33 = vsel %vm446_vm3, %v1195_v32, -inf }
 0x158   : > { %472 = vmax.xlane.f32.xlu2 %v471_v33 }
 0x15c   : > { %v425_v34 = vpop.f32.mrf.mxu2 }
 0x15d   : > { %v1200_v35 = vadd.f32 %v1155_v6, %v425_v34 }
 0x15f   : > { %v474_v36 = vsel %vm446_vm3, %v1200_v35, -inf }
 0x160   : > { %475 = vmax.xlane.f32.xlu0 %v474_v36 }
 0x164   : > { %v428_v37 = vpop.f32.mrf.mxu2 }
 0x165   : > { %v1205_v38 = vadd.f32 %v1155_v6, %v428_v37 }
 0x167   : > { %v477_v39 = vsel %vm446_vm3, %v1205_v38, -inf }
 0x168   : > { %478 = vmax.xlane.f32.xlu1 %v477_v39 }
 0x16c   : > { %v431_v40 = vpop.f32.mrf.mxu2 }
 0x16d   : > { %v1210_v41 = vadd.f32 %v1155_v6, %v431_v40 }
 0x16f   : > { %v480_v42 = vsel %vm446_vm3, %v1210_v41, -inf }
 0x170   : > { %481 = vmax.xlane.f32.xlu2 %v480_v42 }
 0x174   : > { %v434_v43 = vpop.f32.mrf.mxu2 }
 0x175   : > { %v1215_v44 = vadd.f32 %v1155_v6, %v434_v43 }
 0x177   : > { %v483_v45 = vsel %vm446_vm3, %v1215_v44, -inf }
 0x178   : > { %484 = vmax.xlane.f32.xlu0 %v483_v45 }
 0x17c   : > { %v437_v46 = vpop.f32.mrf.mxu2 }
 0x17d   : > { %v1220_v47 = vadd.f32 %v1155_v6, %v437_v46 }
 0x17f   : > { %v486_v48 = vsel %vm446_vm3, %v1220_v47, -inf }
 0x180   : > { %487 = vmax.xlane.f32.xlu1 %v486_v48 }
 0x184   : > { %v440_v49 = vpop.f32.mrf.mxu2 }
 0x185   : > { %v1225_v50 = vadd.f32 %v1155_v6, %v440_v49  ;;  %v449_v51 = vpop.xlane.xlu0 %448 }
 0x186   : > { %v495_v52 = vsub.f32 %v399_v8, %v449_v51 }
 0x187   : > { %v489_v53 = vsel %vm446_vm3, %v1225_v50, -inf }
 0x188   : > { %v511_v54 = vmul.f32 1.442695, %v495_v52  ;;  %490 = vmax.xlane.f32.xlu2 %v489_v53 }
 0x18a   : > { %961 = vpow2.f32 %v511_v54 }
 0x18c   : > { %v443_v55 = vpop.f32.mrf.mxu2 }
 0x18d   : > { %v1230_v56 = vadd.f32 %v1155_v6, %v443_v55  ;;  %v452_v57 = vpop.xlane.xlu0 %451 }
 0x18e   : > { %v496_v58 = vsub.f32 %v1160_v11, %v452_v57 }
 0x18f   : > { %v492_v59 = vsel %vm446_vm3, %v1230_v56, -inf }
 0x190   : > { %v1235_v60 = vpop.eup %961  ;;  %v513_v61 = vmul.f32 1.442695, %v496_v58  ;;  %493 = vmax.xlane.f32.xlu0 %v492_v59 }
 0x191   : > { %v543_v62 = vsel %vm446_vm3, %v1235_v60, 0.0 }
 0x192   : > { %963 = vpow2.f32 %v513_v61  ;;  %544 = vadd.xlane.f32.xlu1 %v543_v62 }
 0x195   : > { %v455_v63 = vpop.xlane.xlu1 %454 }
 0x196   : > { %v497_v0 = vsub.f32 %v1165_v14, %v455_v63 }
 0x198   : > { %v1240_v1 = vpop.eup %963  ;;  %v515_v2 = vmul.f32 1.442695, %v497_v0 }
 0x199   : > { %v546_v3 = vsel %vm446_vm3, %v1240_v1, 0.0 }
 0x19a   : > { %965 = vpow2.f32 %v515_v2  ;;  %547 = vadd.xlane.f32.xlu2 %v546_v3 }
 0x19d   : > { %v458_v4 = vpop.xlane.xlu1 %457 }
 0x19e   : > { %v498_v5 = vsub.f32 %v1170_v17, %v458_v4 }
 0x1a0   : > { %v1245_v6 = vpop.eup %965  ;;  %v517_v7 = vmul.f32 1.442695, %v498_v5 }
 0x1a1   : > { %v549_v8 = vsel %vm446_vm3, %v1245_v6, 0.0 }
 0x1a2   : > { %967 = vpow2.f32 %v517_v7  ;;  %550 = vadd.xlane.f32.xlu0 %v549_v8 }
 0x1a5   : > { %v461_v9 = vpop.xlane.xlu2 %460 }
 0x1a6   : > { %v499_v10 = vsub.f32 %v1175_v20, %v461_v9 }
 0x1a8   : > { %v1250_v11 = vpop.eup %967  ;;  %v519_v12 = vmul.f32 1.442695, %v499_v10 }
 0x1a9   : > { %v552_v13 = vsel %vm446_vm3, %v1250_v11, 0.0 }
 0x1aa   : > { %969 = vpow2.f32 %v519_v12  ;;  %553 = vadd.xlane.f32.xlu1 %v552_v13 }
 0x1ad   : > { %v464_v14 = vpop.xlane.xlu2 %463 }
 0x1ae   : > { %v500_v15 = vsub.f32 %v1180_v23, %v464_v14 }
 0x1b0   : > { %v1255_v16 = vpop.eup %969  ;;  %v521_v17 = vmul.f32 1.442695, %v500_v15 }
 0x1b1   : > { %v555_v18 = vsel %vm446_vm3, %v1255_v16, 0.0 }
 0x1b2   : > { %971 = vpow2.f32 %v521_v17  ;;  %556 = vadd.xlane.f32.xlu2 %v555_v18 }
 0x1b5   : > { %v467_v19 = vpop.xlane.xlu0 %466 }
 0x1b6   : > { %v501_v20 = vsub.f32 %v1185_v26, %v467_v19 }
 0x1b8   : > { %v1260_v21 = vpop.eup %971  ;;  %v523_v22 = vmul.f32 1.442695, %v501_v20 }
 0x1b9   : > { %v558_v24 = vsel %vm446_vm3, %v1260_v21, 0.0 }
 0x1ba   : > { %973 = vpow2.f32 %v523_v22  ;;  %559 = vadd.xlane.f32.xlu0 %v558_v24 }
 0x1bd   : > { %v470_v23 = vpop.xlane.xlu1 %469 }
 0x1be   : > { %v502_v25 = vsub.f32 %v1190_v29, %v470_v23 }
 0x1c0   : > { %v1265_v27 = vpop.eup %973  ;;  %v525_v28 = vmul.f32 1.442695, %v502_v25 }
 0x1c1   : > { %v561_v30 = vsel %vm446_vm3, %v1265_v27, 0.0 }
 0x1c2   : > { %975 = vpow2.f32 %v525_v28  ;;  %562 = vadd.xlane.f32.xlu1 %v561_v30 }
 0x1c8   : > { %v1269_v26 = vpop.eup %975 }
 0x1c9   : > { %v564_v31 = vsel %vm446_vm3, %v1269_v26, 0.0 }
 0x1ca   : > { %565 = vadd.xlane.f32.xlu2 %v564_v31 }
 0x1cb   : > { %v473_v33 = vpop.xlane.xlu2 %472 }
 0x1cc   : > { %v503_v34 = vsub.f32 %v1195_v32, %v473_v33 }
 0x1ce   : > { %v527_v36 = vmul.f32 1.442695, %v503_v34 }
 0x1d0   : > { %977 = vpow2.f32 %v527_v36 }
 0x1d3   : > { %v476_v29 = vpop.xlane.xlu0 %475 }
 0x1d4   : > { %v504_v37 = vsub.f32 %v1200_v35, %v476_v29 }
 0x1d6   : > { %v1275_v39 = vpop.eup %977  ;;  %v529_v40 = vmul.f32 1.442695, %v504_v37 }
 0x1d7   : > { %v567_v42 = vsel %vm446_vm3, %v1275_v39, 0.0 }
 0x1d8   : > { %979 = vpow2.f32 %v529_v40  ;;  %568 = vadd.xlane.f32.xlu0 %v567_v42 }
 0x1db   : > { %v479_v43 = vpop.xlane.xlu1 %478 }
 0x1dc   : > { %v505_v45 = vsub.f32 %v1205_v38, %v479_v43 }
 0x1de   : > { %v1280_v46 = vpop.eup %979  ;;  %v531_v48 = vmul.f32 1.442695, %v505_v45 }
 0x1df   : > { %v570_v32 = vsel %vm446_vm3, %v1280_v46, 0.0 }
 0x1e0   : > { %981 = vpow2.f32 %v531_v48  ;;  %571 = vadd.xlane.f32.xlu1 %v570_v32 }
 0x1e3   : > { %v482_v35 = vpop.xlane.xlu2 %481 }
 0x1e4   : > { %v506_v49 = vsub.f32 %v1210_v41, %v482_v35 }
 0x1e6   : > { %v1285_v51 = vpop.eup %981  ;;  %v533_v52 = vmul.f32 1.442695, %v506_v49 }
 0x1e7   : > { %v573_v53 = vsel %vm446_vm3, %v1285_v51, 0.0 }
 0x1e8   : > { %983 = vpow2.f32 %v533_v52  ;;  %574 = vadd.xlane.f32.xlu2 %v573_v53 }
 0x1eb   : > { %v485_v38 = vpop.xlane.xlu0 %484 }
 0x1ec   : > { %v507_v54 = vsub.f32 %v1215_v44, %v485_v38 }
 0x1ee   : > { %v1290_v55 = vpop.eup %983  ;;  %v535_v57 = vmul.f32 1.442695, %v507_v54 }
 0x1ef   : > { %v576_v58 = vsel %vm446_vm3, %v1290_v55, 0.0 }
 0x1f0   : > { %985 = vpow2.f32 %v535_v57  ;;  %577 = vadd.xlane.f32.xlu0 %v576_v58 }
 0x1f3   : > { %v488_v41 = vpop.xlane.xlu1 %487 }
 0x1f4   : > { %v508_v59 = vsub.f32 %v1220_v47, %v488_v41 }
 0x1f6   : > { %v1295_v61 = vpop.eup %985  ;;  %v537_v62 = vmul.f32 1.442695, %v508_v59 }
 0x1f7   : > { %v579_v63 = vsel %vm446_vm3, %v1295_v61, 0.0 }
 0x1f8   : > { %987 = vpow2.f32 %v537_v62  ;;  %580 = vadd.xlane.f32.xlu1 %v579_v63 }
 0x1fb   : > { %v491_v44 = vpop.xlane.xlu2 %490 }
 0x1fc   : > { %v509_v0 = vsub.f32 %v1225_v50, %v491_v44 }
 0x1fe   : > { %v1300_v2 = vpop.eup %987  ;;  %v539_v3 = vmul.f32 1.442695, %v509_v0 }
 0x1ff   : > { %v582_v4 = vsel %vm446_vm3, %v1300_v2, 0.0 }
 0x200   : > { %989 = vpow2.f32 %v539_v3  ;;  %583 = vadd.xlane.f32.xlu2 %v582_v4 }
 0x203   : > { %v494_v47 = vpop.xlane.xlu0 %493 }
 0x204   : > { %v510_v5 = vsub.f32 %v1230_v56, %v494_v47 }
 0x205   : > { %v545_v7 = vpop.xlane.xlu1 %544 }
 0x206   : > { %v1305_v8 = vpop.eup %989  ;;  %v541_v9 = vmul.f32 1.442695, %v510_v5  ;;  %991 = vrcp.f32 %v545_v7  ;;  %v602_v17 = vand.u32 2147483648, %v545_v7  ;;  %v600_v19 = vand.u32 2147483647, %v545_v7 }
 0x207   : > { %v585_v10 = vsel %vm446_vm3, %v1305_v8, 0.0  ;;  %vm596_vm5 = vweird.f32 %v545_v7 }
 0x208   : > { %993 = vpow2.f32 %v541_v9  ;;  %586 = vadd.xlane.f32.xlu0 %v585_v10  ;;  %v603_v24 = vor.u32 1.1754944e-38, %v602_v17  ;;  %vm601_vm7 = vcmp.eq.f32.partialorder %v600_v19, 8.507059e+37 }
 0x20c   : > { %v992_v50 = vpop.eup %991 }
 0x20d   : > { %v592_v12 = vmul.f32 %v992_v50, %v545_v7  ;;  %v548_v13 = vpop.xlane.xlu2 %547  ;;  %vm597_vm4 = vweird.f32 %v992_v50 }
 0x20e   : > { %v1309_v14 = vpop.eup %993  ;;  %995 = vrcp.f32 %v548_v13  ;;  %vm598_vm6 = vmor %vm596_vm5, %vm597_vm4  ;;  %v617_v34 = vand.u32 2147483648, %v548_v13  ;;  %v615_v29 = vand.u32 2147483647, %v548_v13  ;;  %vm611_vm9 = vweird.f32 %v548_v13 }
 0x20f   : > { %v593_v15 = vsub.f32 1.0, %v592_v12  ;;  %v588_v56 = vsel %vm446_vm3, %v1309_v14, 0.0 }
 0x210   : > { %589 = vadd.xlane.f32.xlu1 %v588_v56  ;;  %v618_v42 = vor.u32 1.1754944e-38, %v617_v34  ;;  %vm616_vm11 = vcmp.eq.f32.partialorder %v615_v29, 8.507059e+37 }
 0x211   : > { %v594_v18 = vmul.f32 %v992_v50, %v593_v15 }
 0x213   : > { %v595_v20 = vadd.f32 %v992_v50, %v594_v18 }
 0x214   : > { %v996_v22 = vpop.eup %995 }
 0x215   : > { %v599_v23 = vsel %vm598_vm6, %v992_v50, %v595_v20  ;;  %v607_v25 = vmul.f32 %v996_v22, %v548_v13  ;;  %v551_v28 = vpop.xlane.xlu0 %550  ;;  %vm612_vm8 = vweird.f32 %v996_v22 }
 0x216   : > { %v604_v30 = vsel %vm601_vm7, %v603_v24, %v599_v23  ;;  %997 = vrcp.f32 %v551_v28  ;;  %vm613_vm10 = vmor %vm611_vm9, %vm612_vm8  ;;  %v632_v49 = vand.u32 2147483648, %v551_v28  ;;  %v630_v53 = vand.u32 2147483647, %v551_v28 }
 0x217   : > { %v605_v31 = vmul.f32 %v1235_v60, %v604_v30  ;;  %v608_v33 = vsub.f32 1.0, %v607_v25  ;;  %vm626_vm13 = vweird.f32 %v551_v28 }
 0x218   : > { %v633_v57 = vor.u32 1.1754944e-38, %v632_v49  ;;  %vm631_vm15 = vcmp.eq.f32.partialorder %v630_v53, 8.507059e+37 }
 0x219   : > { %831 = vst.msk [vmem:[%s1318_s6] sm:$0xff] %vm446_vm3, %v605_v31  ;;  %v609_v36 = vmul.f32 %v996_v22, %v608_v33 }
 0x21b   : > { %v610_v37 = vadd.f32 %v996_v22, %v609_v36 }
 0x21c   : > { %v998_v40 = vpop.eup %997 }
 0x21d   : > { %v614_v43 = vsel %vm613_vm10, %v996_v22, %v610_v37  ;;  %v622_v45 = vmul.f32 %v998_v40, %v551_v28  ;;  %v554_v48 = vpop.xlane.xlu1 %553  ;;  %vm627_vm12 = vweird.f32 %v998_v40 }
 0x21e   : > { %v619_v32 = vsel %vm616_vm11, %v618_v42, %v614_v43  ;;  %999 = vrcp.f32 %v554_v48  ;;  %vm628_vm14 = vmor %vm626_vm13, %vm627_vm12  ;;  %v647_v44 = vand.u32 2147483648, %v554_v48  ;;  %v645_v3 = vand.u32 2147483647, %v554_v48 }
 0x21f   : > { %v620_v60 = vmul.f32 %v1240_v1, %v619_v32  ;;  %v623_v35 = vsub.f32 1.0, %v622_v45  ;;  %vm641_vm1 = vweird.f32 %v554_v48 }
 0x220   : > { %v648_v5 = vor.u32 1.1754944e-38, %v647_v44  ;;  %vm646_vm4 = vcmp.eq.f32.partialorder %v645_v3, 8.507059e+37 }
 0x221   : > { %832 = vst.msk [vmem:[%s1318_s6 + $0x8] sm:$0xff] %vm446_vm3, %v620_v60  ;;  %v624_v52 = vmul.f32 %v998_v40, %v623_v35 }
 0x223   : > { %v625_v38 = vadd.f32 %v998_v40, %v624_v52 }
 0x224   : > { %v1000_v54 = vpop.eup %999 }
 0x225   : > { %v629_v58 = vsel %vm628_vm14, %v998_v40, %v625_v38  ;;  %v637_v41 = vmul.f32 %v1000_v54, %v554_v48  ;;  %v557_v59 = vpop.xlane.xlu2 %556  ;;  %vm642_vm0 = vweird.f32 %v1000_v54 }
 0x226   : > { %v634_v62 = vsel %vm631_vm15, %v633_v57, %v629_v58  ;;  %1001 = vrcp.f32 %v557_v59  ;;  %vm643_vm2 = vmor %vm641_vm1, %vm642_vm0  ;;  %v662_v13 = vand.u32 2147483648, %v557_v59  ;;  %v660_v56 = vand.u32 2147483647, %v557_v59 }
 0x227   : > { %v635_v1 = vmul.f32 %v1245_v6, %v634_v62  ;;  %v638_v63 = vsub.f32 1.0, %v637_v41  ;;  %vm656_vm6 = vweird.f32 %v557_v59 }
 0x228   : > { %v663_v19 = vor.u32 1.1754944e-38, %v662_v13  ;;  %vm661_vm8 = vcmp.eq.f32.partialorder %v660_v56, 8.507059e+37 }
 0x229   : > { %833 = vst.msk [vmem:[%s1318_s6 + $0x10] sm:$0xff] %vm446_vm3, %v635_v1  ;;  %v639_v0 = vmul.f32 %v1000_v54, %v638_v63 }
 0x22b   : > { %v640_v4 = vadd.f32 %v1000_v54, %v639_v0 }
 0x22c   : > { %v1002_v47 = vpop.eup %1001 }
 0x22d   : > { %v644_v7 = vsel %vm643_vm2, %v1000_v54, %v640_v4  ;;  %v652_v9 = vmul.f32 %v1002_v47, %v557_v59  ;;  %v560_v10 = vpop.xlane.xlu0 %559  ;;  %vm657_vm5 = vweird.f32 %v1002_v47 }
 0x22e   : > { %v649_v50 = vsel %vm646_vm4, %v648_v5, %v644_v7  ;;  %1003 = vrcp.f32 %v560_v10  ;;  %vm658_vm7 = vmor %vm656_vm6, %vm657_vm5  ;;  %v677_v28 = vand.u32 2147483648, %v560_v10  ;;  %v675_v31 = vand.u32 2147483647, %v560_v10 }
 0x22f   : > { %v650_v6 = vmul.f32 %v1250_v11, %v649_v50  ;;  %v653_v12 = vsub.f32 1.0, %v652_v9  ;;  %vm671_vm10 = vweird.f32 %v560_v10 }
 0x230   : > { %v678_v36 = vor.u32 1.1754944e-38, %v677_v28  ;;  %vm676_vm12 = vcmp.eq.f32.partialorder %v675_v31, 8.507059e+37 }
 0x231   : > { %834 = vst.msk [vmem:[%s1318_s6 + $0x18] sm:$0xff] %vm446_vm3, %v650_v6  ;;  %v654_v15 = vmul.f32 %v1002_v47, %v653_v12 }
 0x233   : > { %v655_v17 = vadd.f32 %v1002_v47, %v654_v15 }
 0x234   : > { %v1004_v18 = vpop.eup %1003 }
 0x235   : > { %v659_v20 = vsel %vm658_vm7, %v1002_v47, %v655_v17  ;;  %v667_v22 = vmul.f32 %v1004_v18, %v560_v10  ;;  %v563_v24 = vpop.xlane.xlu1 %562  ;;  %vm672_vm9 = vweird.f32 %v1004_v18 }
 0x236   : > { %v664_v23 = vsel %vm661_vm8, %v663_v19, %v659_v20  ;;  %1005 = vrcp.f32 %v563_v24  ;;  %vm673_vm11 = vmor %vm671_vm10, %vm672_vm9  ;;  %v692_v45 = vand.u32 2147483648, %v563_v24  ;;  %v690_v32 = vand.u32 2147483647, %v563_v24 }
 0x237   : > { %v665_v11 = vmul.f32 %v1255_v16, %v664_v23  ;;  %v668_v25 = vsub.f32 1.0, %v667_v22  ;;  %vm686_vm14 = vweird.f32 %v563_v24 }
 0x238   : > { %v693_v49 = vor.u32 1.1754944e-38, %v692_v45  ;;  %vm691_vm0 = vcmp.eq.f32.partialorder %v690_v32, 8.507059e+37 }
 0x239   : > { %835 = vst.msk [vmem:[%s1318_s6 + $0x20] sm:$0xff] %vm446_vm3, %v665_v11  ;;  %v669_v30 = vmul.f32 %v1004_v18, %v668_v25 }
 0x23b   : > { %v670_v33 = vadd.f32 %v1004_v18, %v669_v30 }
 0x23c   : > { %v1006_v34 = vpop.eup %1005 }
 0x23d   : > { %v674_v29 = vsel %vm673_vm11, %v1004_v18, %v670_v33  ;;  %v682_v37 = vmul.f32 %v1006_v34, %v563_v24  ;;  %v566_v40 = vpop.xlane.xlu2 %565  ;;  %vm687_vm13 = vweird.f32 %v1006_v34 }
 0x23e   : > { %v679_v42 = vsel %vm676_vm12, %v678_v36, %v674_v29  ;;  %1007 = vrcp.f32 %v566_v40  ;;  %vm688_vm15 = vmor %vm686_vm14, %vm687_vm13  ;;  %v707_v57 = vand.u32 2147483648, %v566_v40  ;;  %v705_v41 = vand.u32 2147483647, %v566_v40 }
 0x23f   : > { %v680_v16 = vmul.f32 %v1260_v21, %v679_v42  ;;  %v683_v43 = vsub.f32 1.0, %v682_v37  ;;  %vm701_vm2 = vweird.f32 %v566_v40 }
 0x240   : > { %v708_v1 = vor.u32 1.1754944e-38, %v707_v57  ;;  %vm706_vm5 = vcmp.eq.f32.partialorder %v705_v41, 8.507059e+37 }
 0x241   : > { %836 = vst.msk [vmem:[%s1318_s6 + $0x28] sm:$0xff] %vm446_vm3, %v680_v16  ;;  %v684_v48 = vmul.f32 %v1006_v34, %v683_v43 }
 0x243   : > { %v685_v60 = vadd.f32 %v1006_v34, %v684_v48 }
 0x244   : > { %v1008_v35 = vpop.eup %1007 }
 0x245   : > { %v689_v52 = vsel %vm688_vm15, %v1006_v34, %v685_v60  ;;  %v697_v53 = vmul.f32 %v1008_v35, %v566_v40  ;;  %vm702_vm1 = vweird.f32 %v1008_v35 }
 0x246   : > { %v694_v38 = vsel %vm691_vm0, %v693_v49, %v689_v52  ;;  %vm703_vm4 = vmor %vm701_vm2, %vm702_vm1 }
 0x247   : > { %v695_v54 = vmul.f32 %v1265_v27, %v694_v38  ;;  %v698_v21 = vsub.f32 1.0, %v697_v53 }
 0x249   : > { %837 = vst.msk [vmem:[%s1318_s6 + $0x30] sm:$0xff] %vm446_vm3, %v695_v54  ;;  %v699_v58 = vmul.f32 %v1008_v35, %v698_v21 }
 0x24b   : > { %v700_v59 = vadd.f32 %v1008_v35, %v699_v58  ;;  %v569_v62 = vpop.xlane.xlu0 %568 }
 0x24c   : > { %1009 = vrcp.f32 %v569_v62  ;;  %v722_v5 = vand.u32 2147483648, %v569_v62  ;;  %v720_v9 = vand.u32 2147483647, %v569_v62  ;;  %vm716_vm7 = vweird.f32 %v569_v62 }
 0x24d   : > { %v704_v63 = vsel %vm703_vm4, %v1008_v35, %v700_v59 }
 0x24e   : > { %v709_v44 = vsel %vm706_vm5, %v708_v1, %v704_v63  ;;  %v723_v6 = vor.u32 1.1754944e-38, %v722_v5  ;;  %vm721_vm9 = vcmp.eq.f32.partialorder %v720_v9, 8.507059e+37 }
 0x24f   : > { %v710_v0 = vmul.f32 %v1269_v26, %v709_v44 }
 0x251   : > { %838 = vst.msk [vmem:[%s1318_s6 + $0x38] sm:$0xff] %vm446_vm3, %v710_v0 }
 0x252   : > { %v1010_v27 = vpop.eup %1009 }
 0x253   : > { %v712_v3 = vmul.f32 %v1010_v27, %v569_v62  ;;  %v572_v4 = vpop.xlane.xlu1 %571  ;;  %vm717_vm6 = vweird.f32 %v1010_v27 }
 0x254   : > { %1011 = vrcp.f32 %v572_v4  ;;  %vm718_vm8 = vmor %vm716_vm7, %vm717_vm6  ;;  %v737_v18 = vand.u32 2147483648, %v572_v4  ;;  %v735_v20 = vand.u32 2147483647, %v572_v4  ;;  %vm731_vm11 = vweird.f32 %v572_v4 }
 0x255   : > { %v713_v47 = vsub.f32 1.0, %v712_v3 }
 0x256   : > { %v738_v23 = vor.u32 1.1754944e-38, %v737_v18  ;;  %vm736_vm13 = vcmp.eq.f32.partialorder %v735_v20, 8.507059e+37 }
 0x257   : > { %v714_v7 = vmul.f32 %v1010_v27, %v713_v47 }
 0x259   : > { %v715_v10 = vadd.f32 %v1010_v27, %v714_v7 }
 0x25a   : > { %v1012_v50 = vpop.eup %1011 }
 0x25b   : > { %v719_v12 = vsel %vm718_vm8, %v1010_v27, %v715_v10  ;;  %v727_v26 = vmul.f32 %v1012_v50, %v572_v4  ;;  %v575_v13 = vpop.xlane.xlu2 %574  ;;  %vm732_vm10 = vweird.f32 %v1012_v50 }
 0x25c   : > { %v724_v15 = vsel %vm721_vm9, %v723_v6, %v719_v12  ;;  %1013 = vrcp.f32 %v575_v13  ;;  %vm733_vm12 = vmor %vm731_vm11, %vm732_vm10  ;;  %v752_v33 = vand.u32 2147483648, %v575_v13  ;;  %v750_v36 = vand.u32 2147483647, %v575_v13 }
 0x25d   : > { %v725_v56 = vmul.f32 %v1275_v39, %v724_v15  ;;  %v728_v17 = vsub.f32 1.0, %v727_v26  ;;  %vm746_vm15 = vweird.f32 %v575_v13 }
 0x25e   : > { %v753_v40 = vor.u32 1.1754944e-38, %v752_v33  ;;  %vm751_vm1 = vcmp.eq.f32.partialorder %v750_v36, 8.507059e+37 }
 0x25f   : > { %839 = vst.msk [vmem:[%s1318_s6 + $0x40] sm:$0xff] %vm446_vm3, %v725_v56  ;;  %v729_v19 = vmul.f32 %v1012_v50, %v728_v17 }
 0x261   : > { %v730_v22 = vadd.f32 %v1012_v50, %v729_v19 }
 0x262   : > { %v1014_v24 = vpop.eup %1013 }
 0x263   : > { %v734_v11 = vsel %vm733_vm12, %v1012_v50, %v730_v22  ;;  %v742_v25 = vmul.f32 %v1014_v24, %v575_v13  ;;  %v578_v28 = vpop.xlane.xlu0 %577  ;;  %vm747_vm14 = vweird.f32 %v1014_v24 }
 0x264   : > { %v739_v30 = vsel %vm736_vm13, %v738_v23, %v734_v11  ;;  %1015 = vrcp.f32 %v578_v28  ;;  %vm748_vm0 = vmor %vm746_vm15, %vm747_vm14  ;;  %v767_v32 = vand.u32 2147483648, %v578_v28  ;;  %v765_v35 = vand.u32 2147483647, %v578_v28 }
 0x265   : > { %v740_v39 = vmul.f32 %v1280_v46, %v739_v30  ;;  %v743_v31 = vsub.f32 1.0, %v742_v25  ;;  %vm761_vm4 = vweird.f32 %v578_v28 }
 0x266   : > { %v768_v53 = vor.u32 1.1754944e-38, %v767_v32  ;;  %vm766_vm6 = vcmp.eq.f32.partialorder %v765_v35, 8.507059e+37 }
 0x267   : > { %840 = vst.msk [vmem:[%s1318_s6 + $0x48] sm:$0xff] %vm446_vm3, %v740_v39  ;;  %v744_v34 = vmul.f32 %v1014_v24, %v743_v31 }
 0x269   : > { %v745_v29 = vadd.f32 %v1014_v24, %v744_v34 }
 0x26a   : > { %v1016_v37 = vpop.eup %1015 }
 0x26b   : > { %v749_v42 = vsel %vm748_vm0, %v1014_v24, %v745_v29  ;;  %v757_v16 = vmul.f32 %v1016_v37, %v578_v28  ;;  %v581_v43 = vpop.xlane.xlu1 %580  ;;  %vm762_vm2 = vweird.f32 %v1016_v37 }
 0x26c   : > { %v754_v45 = vsel %vm751_vm1, %v753_v40, %v749_v42  ;;  %1017 = vrcp.f32 %v581_v43  ;;  %vm763_vm5 = vmor %vm761_vm4, %vm762_vm2  ;;  %v782_v41 = vand.u32 2147483648, %v581_v43  ;;  %v780_v62 = vand.u32 2147483647, %v581_v43 }
 0x26d   : > { %v755_v46 = vmul.f32 %v1285_v51, %v754_v45  ;;  %v758_v48 = vsub.f32 1.0, %v757_v16  ;;  %vm776_vm8 = vweird.f32 %v581_v43 }
 0x26e   : > { %v783_v44 = vor.u32 1.1754944e-38, %v782_v41  ;;  %vm781_vm10 = vcmp.eq.f32.partialorder %v780_v62, 8.507059e+37 }
 0x26f   : > { %841 = vst.msk [vmem:[%s1318_s6 + $0x50] sm:$0xff] %vm446_vm3, %v755_v46  ;;  %v759_v60 = vmul.f32 %v1016_v37, %v758_v48 }
 0x271   : > { %v760_v49 = vadd.f32 %v1016_v37, %v759_v60 }
 0x272   : > { %v1018_v52 = vpop.eup %1017 }
 0x273   : > { %v764_v38 = vsel %vm763_vm5, %v1016_v37, %v760_v49  ;;  %v772_v54 = vmul.f32 %v1018_v52, %v581_v43  ;;  %v584_v21 = vpop.xlane.xlu2 %583  ;;  %vm777_vm7 = vweird.f32 %v1018_v52 }
 0x274   : > { %v769_v57 = vsel %vm766_vm6, %v768_v53, %v764_v38  ;;  %1019 = vrcp.f32 %v584_v21  ;;  %vm778_vm9 = vmor %vm776_vm8, %vm777_vm7  ;;  %v797_v5 = vand.u32 2147483648, %v584_v21  ;;  %v795_v9 = vand.u32 2147483647, %v584_v21 }
 0x275   : > { %v770_v51 = vmul.f32 %v1290_v55, %v769_v57  ;;  %v773_v58 = vsub.f32 1.0, %v772_v54  ;;  %vm791_vm12 = vweird.f32 %v584_v21 }
 0x276   : > { %v798_v6 = vor.u32 1.1754944e-38, %v797_v5  ;;  %vm796_vm14 = vcmp.eq.f32.partialorder %v795_v9, 8.507059e+37 }
 0x277   : > { %842 = vst.msk [vmem:[%s1318_s6 + $0x58] sm:$0xff] %vm446_vm3, %v770_v51  ;;  %v774_v59 = vmul.f32 %v1018_v52, %v773_v58 }
 0x279   : > { %v775_v1 = vadd.f32 %v1018_v52, %v774_v59 }
 0x27a   : > { %v1020_v63 = vpop.eup %1019 }
 0x27b   : > { %v779_v0 = vsel %vm778_vm9, %v1018_v52, %v775_v1  ;;  %v787_v27 = vmul.f32 %v1020_v63, %v584_v21  ;;  %v587_v3 = vpop.xlane.xlu0 %586  ;;  %vm792_vm11 = vweird.f32 %v1020_v63 }
 0x27c   : > { %v784_v4 = vsel %vm781_vm10, %v783_v44, %v779_v0  ;;  %1021 = vrcp.f32 %v587_v3  ;;  %vm793_vm13 = vmor %vm791_vm12, %vm792_vm11  ;;  %v812_v17 = vand.u32 2147483648, %v587_v3  ;;  %v810_v19 = vand.u32 2147483647, %v587_v3 }
 0x27d   : > { %v785_v55 = vmul.f32 %v1295_v61, %v784_v4  ;;  %v788_v47 = vsub.f32 1.0, %v787_v27  ;;  %vm806_vm0 = vweird.f32 %v587_v3 }
 0x27e   : > { %v813_v24 = vor.u32 1.1754944e-38, %v812_v17  ;;  %vm811_vm2 = vcmp.eq.f32.partialorder %v810_v19, 8.507059e+37 }
 0x27f   : > { %843 = vst.msk [vmem:[%s1318_s6 + $0x60] sm:$0xff] %vm446_vm3, %v785_v55  ;;  %v789_v7 = vmul.f32 %v1020_v63, %v788_v47 }
 0x281   : > { %v790_v10 = vadd.f32 %v1020_v63, %v789_v7 }
 0x282   : > { %v1022_v50 = vpop.eup %1021 }
 0x283   : > { %v794_v12 = vsel %vm793_vm13, %v1020_v63, %v790_v10  ;;  %v802_v26 = vmul.f32 %v1022_v50, %v587_v3  ;;  %v590_v13 = vpop.xlane.xlu1 %589  ;;  %vm807_vm15 = vweird.f32 %v1022_v50 }
 0x284   : > { %v799_v15 = vsel %vm796_vm14, %v798_v6, %v794_v12  ;;  %1023 = vrcp.f32 %v590_v13  ;;  %vm808_vm1 = vmor %vm806_vm0, %vm807_vm15  ;;  %v827_v30 = vand.u32 2147483648, %v590_v13  ;;  %v825_v31 = vand.u32 2147483647, %v590_v13 }
 0x285   : > { %v800_v61 = vmul.f32 %v1300_v2, %v799_v15  ;;  %v803_v56 = vsub.f32 1.0, %v802_v26  ;;  %vm821_vm5 = vweird.f32 %v590_v13 }
 0x286   : > { %v828_v34 = vor.u32 1.1754944e-38, %v827_v30  ;;  %vm826_vm7 = vcmp.eq.f32.partialorder %v825_v31, 8.507059e+37 }
 0x287   : > { %844 = vst.msk [vmem:[%s1318_s6 + $0x68] sm:$0xff] %vm446_vm3, %v800_v61  ;;  %v804_v18 = vmul.f32 %v1022_v50, %v803_v56 }
 0x289   : > { %v805_v20 = vadd.f32 %v1022_v50, %v804_v18 }
 0x28a   : > { %v1024_v22 = vpop.eup %1023 }
 0x28b   : > { %v809_v23 = vsel %vm808_vm1, %v1022_v50, %v805_v20  ;;  %v817_v11 = vmul.f32 %v1024_v22, %v590_v13  ;;  %vm822_vm4 = vweird.f32 %v1024_v22 }
 0x28c   : > { %v814_v25 = vsel %vm811_vm2, %v813_v24, %v809_v23  ;;  %vm823_vm6 = vmor %vm821_vm5, %vm822_vm4 }
 0x28d   : > { %v815_v2 = vmul.f32 %v1305_v8, %v814_v25  ;;  %v818_v28 = vsub.f32 1.0, %v817_v11 }
 0x28f   : > { %845 = vst.msk [vmem:[%s1318_s6 + $0x70] sm:$0xff] %vm446_vm3, %v815_v2  ;;  %v819_v39 = vmul.f32 %v1024_v22, %v818_v28 }
 0x291   : > { %v820_v33 = vadd.f32 %v1024_v22, %v819_v39 }
 0x293   : > { %v824_v36 = vsel %vm823_vm6, %v1024_v22, %v820_v33 }
 0x294   : > { %v829_v29 = vsel %vm826_vm7, %v828_v34, %v824_v36 }
 0x295   : > { %v830_v37 = vmul.f32 %v1309_v14, %v829_v29 }
 0x297   : > { %846 = vst.msk [vmem:[%s1318_s6 + $0x78] sm:$0xff] %vm446_vm3, %v830_v37 }
 0x298 PF: > { %s13_s12 = sadd.s32 1, %s1031_s12  }
 0x299   : > { %p10_p4 = scmp.ge.s32.totalorder %s13_s12, 4  }
 0x29b   :  { %12 = sbr.rel (!%p10_p4) target bundleno = 1 (0x1), region = 62 }

</bundles_post_ra>
